<compile_context>
chip_gen: v5e
topology: v5e:2x2
jax: 0.10.0
libtpu: 0.0.40
codegen_flags: <defaults>
</compile_context>

<pallas_src>
import jax
import jax.numpy as jnp
from jax.experimental import pallas as pl
from jax.experimental.pallas import tpu as pltpu


_SUBLANE = 8    # sublane granularity for the token (second-to-last) dim


def _round_up(x: int, m: int) -> int:
    return ((x + m - 1) // m) * m


def _make_decoder_kernel(n_layers: int, mm_dtype):
    """Fused MLP kernel: n_layers x (Linear + ReLU) on one (TM, d_in) token tile."""

    def kernel(*refs):
        # refs = (z_ref, w0, b0, w1, b1, ..., out_ref)
        z_ref = refs[0]
        out_ref = refs[-1]
        params = refs[1:-1]

        x = z_ref[...]                                   # (TM, d_in), mm_dtype
        for l in range(n_layers):
            w = params[2 * l][...]                       # (d_in_l, d_out_l), mm_dtype
            b = params[2 * l + 1][...]                   # (1, d_out_l), f32
            acc = jnp.dot(x, w, preferred_element_type=jnp.float32)
            # ReLU after every Linear (including the last), matching the
            # reference module's `_construct_mlp` behaviour.
            acc = jnp.maximum(acc + b, 0.0)
            # Feed the next MXU op in the input dtype (bf16 stays bf16 on
            # v6e/v7x; f32 stays f32 so results match the f32 reference).
            x = acc if l == n_layers - 1 else acc.astype(mm_dtype)
        out_ref[...] = x.astype(out_ref.dtype)

    return kernel


def decoder_reference(z, weights, biases):
    """Pure-JAX reference (also used as the small-M fallback path)."""
    x = z
    for w, b in zip(weights, biases):
        x = jnp.maximum(jnp.dot(x, w) + b, 0.0)
    return x


def decoder_forward(z, weights, biases, *, tm: int = 2048, use_kernel=None):
    """Run the fused decoder MLP.

    Args:
        z: (bs, seq_len, d_in) array (f32 or bf16), d_in = latent + condition.
        weights: list of (d_in_l, d_out_l) arrays (transposed vs. PyTorch's
                 (out, in) layout).
        biases:  list of (d_out_l,) arrays.
        tm: token tile size (rows per grid step), rounded as needed.
        use_kernel: True/False to force the Pallas/XLA path; None = auto
                    (kernel only when bs*seq_len is large enough to pay off).

    Returns:
        (bs, seq_len, d_out_last) array with z's dtype.
    """
    bs, seq_len, d_in = z.shape
    n_layers = len(weights)
    d_out = weights[-1].shape[1]
    M = bs * seq_len

    if use_kernel is None:
        use_kernel = M >= 1024           # below this, fixed overhead dominates
    if not use_kernel:
        return decoder_reference(z, weights, biases).astype(z.dtype)

    mm_dtype = z.dtype                   # MXU input dtype (bf16 stays bf16)

    # ---- row tiling (feature dims stay at natural width) -------------------
    if tm >= M:
        tm_eff = _round_up(M, _SUBLANE)
        steps = 1
    else:
        steps = -(-M // tm)
        if steps > 1 and steps % 2 == 1:
            steps += 1                   # even step count -> balanced on v7x's 2 TCs
        tm_eff = _round_up(-(-M // steps), _SUBLANE)
        steps = -(-M // tm_eff)
    m_pad = tm_eff * steps

    z2d = z.reshape(M, d_in)
    if m_pad != M:
        z2d = jnp.pad(z2d, ((0, m_pad - M), (0, 0)))     # rows only, no lane pad

    w_list = [w.astype(mm_dtype) for w in weights]
    b_list = [b.reshape(1, -1).astype(jnp.float32) for b in biases]

    # z/out tiles move with the grid step; weights/biases are pinned at block
    # (0, 0) so Pallas keeps them resident and never re-fetches them.
    in_specs = [pl.BlockSpec((tm_eff, d_in), lambda i: (i, 0))]
    for w, b in zip(w_list, b_list):
        in_specs.append(pl.BlockSpec(w.shape, lambda i: (0, 0)))
        in_specs.append(pl.BlockSpec(b.shape, lambda i: (0, 0)))

    # Advisory cost estimate so XLA can overlap surrounding ops.
    flops = 2 * m_pad * sum(w.shape[0] * w.shape[1] for w in w_list)
    bytes_accessed = (
        z2d.size * z2d.dtype.itemsize
        + m_pad * d_out * jnp.dtype(z.dtype).itemsize
        + sum(int(w.size) * w.dtype.itemsize for w in w_list)
        + sum(int(b.size) * b.dtype.itemsize for b in b_list)
    )
    cost = pl.CostEstimate(flops=int(flops), transcendentals=0,
                           bytes_accessed=int(bytes_accessed))

    kernel = _make_decoder_kernel(n_layers, mm_dtype)

    out = pl.pallas_call(
        kernel,
        out_shape=jax.ShapeDtypeStruct((m_pad, d_out), z.dtype),
        grid_spec=pltpu.PrefetchScalarGridSpec(
            num_scalar_prefetch=0,
            grid=(steps,),
            in_specs=in_specs,
            out_specs=pl.BlockSpec((tm_eff, d_out), lambda i: (i, 0)),
        ),
        compiler_params=pltpu.CompilerParams(
            # Token tiles are independent -> shard across v7x's 2 TensorCores.
            dimension_semantics=("parallel",),
        ),
        cost_estimate=cost,
    )(z2d, *[p for wb in zip(w_list, b_list) for p in wb])

    return out[:M].reshape(bs, seq_len, d_out)


def _make_params(key, dims):
    """PyTorch nn.Linear default init (uniform +/- 1/sqrt(fan_in))."""
    keys = jax.random.split(key, 2 * (len(dims) - 1))
    weights, biases = [], []
    for l, (din, dout) in enumerate(zip(dims[:-1], dims[1:])):
        bound = 1.0 / jnp.sqrt(jnp.float32(din))
        w = jax.random.uniform(keys[2 * l], (din, dout), jnp.float32,
                               minval=-bound, maxval=bound)
        b = jax.random.uniform(keys[2 * l + 1], (dout,), jnp.float32,
                               minval=-bound, maxval=bound)
        weights.append(w)
        biases.append(b)
    return weights, biases


if __name__ == "__main__":
    key = jax.random.PRNGKey(0)
    k_par, k_z1, k_z2 = jax.random.split(key, 3)

    # Module config: latent_dim=8, condition_dim=8, layer_arch=[32, 32, 16].
    latent_dim, condition_dim = 8, 8
    layer_arch = [32, 32, 16]
    d_in = latent_dim + condition_dim
    dims = [d_in] + layer_arch
    weights, biases = _make_params(k_par, dims)

    # --- small shape consistent with the module (single-tile kernel path) ---
    bs, seq_len = 2, 8
    z = jax.random.normal(k_z1, (bs, seq_len, d_in), jnp.float32)
    out = jax.block_until_ready(decoder_forward(z, weights, biases, use_kernel=True))
    ref = decoder_reference(z, weights, biases)
    assert out.shape == (bs, seq_len, layer_arch[-1]), out.shape
    assert jnp.allclose(out, ref, atol=1e-5, rtol=1e-5), "mismatch (small)"

    # --- larger token count: exercises the multi-step tiled grid path -------
    bs2, seq2 = 4, 600                      # M = 2400 -> 2 x 1200-row tiles
    z2 = jax.random.normal(k_z2, (bs2, seq2, d_in), jnp.float32)
    out2 = jax.block_until_ready(decoder_forward(z2, weights, biases))
    ref2 = decoder_reference(z2, weights, biases)
    assert out2.shape == (bs2, seq2, layer_arch[-1]), out2.shape
    assert jnp.allclose(out2, ref2, atol=1e-5, rtol=1e-5), "mismatch (tiled)"

    # --- auto small-M fallback (plain XLA path) ------------------------------
    out3 = jax.block_until_ready(decoder_forward(z, weights, biases))
    assert jnp.allclose(out3, ref, atol=1e-6, rtol=1e-6), "mismatch (fallback)"

    print("KERNEL_OK")
</pallas_src>

<mosaic_0001>
module attributes {stable_mosaic.version = 11 : i64} {
  func.func @kernel(%arg0: i32, %arg1: memref<16x16xf32, #tpu.memory_space<vmem>>, %arg2: memref<16x32xf32, #tpu.memory_space<vmem>>, %arg3: memref<1x32xf32, #tpu.memory_space<vmem>>, %arg4: memref<32x32xf32, #tpu.memory_space<vmem>>, %arg5: memref<1x32xf32, #tpu.memory_space<vmem>>, %arg6: memref<32x16xf32, #tpu.memory_space<vmem>>, %arg7: memref<1x16xf32, #tpu.memory_space<vmem>>, %arg8: memref<16x16xf32, #tpu.memory_space<vmem>>) attributes {dimension_semantics = [#tpu.dimension_semantics<parallel>], iteration_bounds = array<i64: 1>, scalar_prefetch = 0 : i64, scratch_operands = 0 : i64, tpu.core_type = #tpu.core_type<tc>, window_params = [{transform_indices = @transform_0, window_bounds = array<i64: 16, 16>}, {pipeline_mode = #tpu.pipeline_mode<synchronous>, transform_indices = @transform_1, window_bounds = array<i64: 16, 32>}, {pipeline_mode = #tpu.pipeline_mode<synchronous>, transform_indices = @transform_2, window_bounds = array<i64: 1, 32>}, {pipeline_mode = #tpu.pipeline_mode<synchronous>, transform_indices = @transform_3, window_bounds = array<i64: 32, 32>}, {pipeline_mode = #tpu.pipeline_mode<synchronous>, transform_indices = @transform_4, window_bounds = array<i64: 1, 32>}, {pipeline_mode = #tpu.pipeline_mode<synchronous>, transform_indices = @transform_5, window_bounds = array<i64: 32, 16>}, {pipeline_mode = #tpu.pipeline_mode<synchronous>, transform_indices = @transform_6, window_bounds = array<i64: 1, 16>}, {transform_indices = @transform_7, window_bounds = array<i64: 16, 16>}]} {
    %c0 = arith.constant 0 : index
    %c0_0 = arith.constant 0 : index
    %0 = vector.load %arg1[%c0, %c0_0] : memref<16x16xf32, #tpu.memory_space<vmem>>, vector<16x16xf32>
    %c0_1 = arith.constant 0 : index
    %c0_2 = arith.constant 0 : index
    %1 = vector.load %arg2[%c0_1, %c0_2] : memref<16x32xf32, #tpu.memory_space<vmem>>, vector<16x32xf32>
    %c0_3 = arith.constant 0 : index
    %c0_4 = arith.constant 0 : index
    %2 = vector.load %arg3[%c0_3, %c0_4] : memref<1x32xf32, #tpu.memory_space<vmem>>, vector<1x32xf32>
    %cst = arith.constant dense<0.000000e+00> : vector<16x32xf32>
    %3 = tpu.matmul %0, %1, %cst {dimension_numbers = #tpu.dot_dimension_numbers<[1], [0], [0], [1], [0, 0, 1, 1], [], []>} : vector<16x16xf32>, vector<16x32xf32>, vector<16x32xf32> -> vector<16x32xf32>
    %4 = vector.broadcast %2 : vector<1x32xf32> to vector<16x32xf32>
    %5 = arith.addf %3, %4 : vector<16x32xf32>
    %cst_5 = arith.constant 0.000000e+00 : f32
    %6 = vector.broadcast %cst_5 : f32 to vector<16x32xf32>
    %7 = arith.maximumf %5, %6 : vector<16x32xf32>
    %c0_6 = arith.constant 0 : index
    %c0_7 = arith.constant 0 : index
    %8 = vector.load %arg4[%c0_6, %c0_7] : memref<32x32xf32, #tpu.memory_space<vmem>>, vector<32x32xf32>
    %c0_8 = arith.constant 0 : index
    %c0_9 = arith.constant 0 : index
    %9 = vector.load %arg5[%c0_8, %c0_9] : memref<1x32xf32, #tpu.memory_space<vmem>>, vector<1x32xf32>
    %cst_10 = arith.constant dense<0.000000e+00> : vector<16x32xf32>
    %10 = tpu.matmul %7, %8, %cst_10 {dimension_numbers = #tpu.dot_dimension_numbers<[1], [0], [0], [1], [0, 0, 1, 1], [], []>} : vector<16x32xf32>, vector<32x32xf32>, vector<16x32xf32> -> vector<16x32xf32>
    %11 = vector.broadcast %9 : vector<1x32xf32> to vector<16x32xf32>
    %12 = arith.addf %10, %11 : vector<16x32xf32>
    %cst_11 = arith.constant 0.000000e+00 : f32
    %13 = vector.broadcast %cst_11 : f32 to vector<16x32xf32>
    %14 = arith.maximumf %12, %13 : vector<16x32xf32>
    %c0_12 = arith.constant 0 : index
    %c0_13 = arith.constant 0 : index
    %15 = vector.load %arg6[%c0_12, %c0_13] : memref<32x16xf32, #tpu.memory_space<vmem>>, vector<32x16xf32>
    %c0_14 = arith.constant 0 : index
    %c0_15 = arith.constant 0 : index
    %16 = vector.load %arg7[%c0_14, %c0_15] : memref<1x16xf32, #tpu.memory_space<vmem>>, vector<1x16xf32>
    %cst_16 = arith.constant dense<0.000000e+00> : vector<16x16xf32>
    %17 = tpu.matmul %14, %15, %cst_16 {dimension_numbers = #tpu.dot_dimension_numbers<[1], [0], [0], [1], [0, 0, 1, 1], [], []>} : vector<16x32xf32>, vector<32x16xf32>, vector<16x16xf32> -> vector<16x16xf32>
    %18 = vector.broadcast %16 : vector<1x16xf32> to vector<16x16xf32>
    %19 = arith.addf %17, %18 : vector<16x16xf32>
    %cst_17 = arith.constant 0.000000e+00 : f32
    %20 = vector.broadcast %cst_17 : f32 to vector<16x16xf32>
    %21 = arith.maximumf %19, %20 : vector<16x16xf32>
    %c0_18 = arith.constant 0 : index
    %c0_19 = arith.constant 0 : index
    %22 = vector.load %arg8[%c0_18, %c0_19] : memref<16x16xf32, #tpu.memory_space<vmem>>, vector<16x16xf32>
    tpu.vector_store %arg8[%c0_18, %c0_19], %21 {strides = array<i32>} : memref<16x16xf32, #tpu.memory_space<vmem>>, vector<16x16xf32>,
    return
  }
  func.func @transform_0(%arg0: i32) -> (i32, i32) {
    %c0_i32 = arith.constant 0 : i32
    %c0_i32_0 = arith.constant 0 : i32
    return %arg0, %c0_i32 : i32, i32
  }
  func.func @transform_1(%arg0: i32) -> (i32, i32) {
    %c0_i32 = arith.constant 0 : i32
    %c0_i32_0 = arith.constant 0 : i32
    %c0_i32_1 = arith.constant 0 : i32
    return %c0_i32, %c0_i32_0 : i32, i32
  }
  func.func @transform_2(%arg0: i32) -> (i32, i32) {
    %c0_i32 = arith.constant 0 : i32
    %c0_i32_0 = arith.constant 0 : i32
    %c0_i32_1 = arith.constant 0 : i32
    return %c0_i32, %c0_i32_0 : i32, i32
  }
  func.func @transform_3(%arg0: i32) -> (i32, i32) {
    %c0_i32 = arith.constant 0 : i32
    %c0_i32_0 = arith.constant 0 : i32
    %c0_i32_1 = arith.constant 0 : i32
    return %c0_i32, %c0_i32_0 : i32, i32
  }
  func.func @transform_4(%arg0: i32) -> (i32, i32) {
    %c0_i32 = arith.constant 0 : i32
    %c0_i32_0 = arith.constant 0 : i32
    %c0_i32_1 = arith.constant 0 : i32
    return %c0_i32, %c0_i32_0 : i32, i32
  }
  func.func @transform_5(%arg0: i32) -> (i32, i32) {
    %c0_i32 = arith.constant 0 : i32
    %c0_i32_0 = arith.constant 0 : i32
    %c0_i32_1 = arith.constant 0 : i32
    return %c0_i32, %c0_i32_0 : i32, i32
  }
  func.func @transform_6(%arg0: i32) -> (i32, i32) {
    %c0_i32 = arith.constant 0 : i32
    %c0_i32_0 = arith.constant 0 : i32
    %c0_i32_1 = arith.constant 0 : i32
    return %c0_i32, %c0_i32_0 : i32, i32
  }
  func.func @transform_7(%arg0: i32) -> (i32, i32) {
    %c0_i32 = arith.constant 0 : i32
    %c0_i32_0 = arith.constant 0 : i32
    return %arg0, %c0_i32 : i32, i32
  }
}

</mosaic_0001>

<bundles_post_ra>
// kernel: tpu_custom_call.1
= control target key start
LH: loop header
LB: loop body
LE: loop exit
PB: predicated region body
PF: predicated region fallthrough
CT: control target
= control target key end

     0   :  { %12 = vsyncpa [#allocation3], 0  ;;  %s355_s0 = inlined_call_operand.vmem [shape: f32[16,16], index: 0, kind: input, shape index: {}]   ;;  %s356_s1 = inlined_call_operand.hbm [shape: f32[16,32], index: 1, kind: input, shape index: {}]   ;;  %s357_s2 = inlined_call_operand.vmem [shape: f32[1,32], index: 2, kind: input, shape index: {}]   ;;  %s358_s3 = inlined_call_operand.vmem [shape: f32[32,32], index: 3, kind: input, shape index: {}]   ;;  %s359_s4 = inlined_call_operand.vmem [shape: f32[1,32], index: 4, kind: input, shape index: {}]   ;;  %s360_s5 = inlined_call_operand.vmem [shape: f32[32,16], index: 5, kind: input, shape index: {}]   ;;  %s361_s6 = inlined_call_operand.vmem [shape: f32[1,16], index: 6, kind: input, shape index: {}]   ;;  %s362_s7 = inlined_call_operand.hbm [shape: f32[16,16], index: 7, kind: output, shape index: {}]  }
   0x1   :  { %13 = vsyncpa [#allocation4], 0  ;;  %s20_s26 = sshll.u32 %s356_s1, 4  ;;  %s252_s27 = smov [#allocation2]   ;;  %s21_s26 = int_to_ptr.hbm [resolvable:$true] %s20_s26 }
   0x2   :  { %s22_s28 = sshll.u32 %s252_s27, 4  ;;  %s253_s29 = smov 128   ;;  %s23_s28 = int_to_ptr.vmem [resolvable:$true] %s22_s28 }
   0x3   :  { %s254_s30 = smov 8  }
   0x4   :  { %28 = dma.hbm_to_vmem [thread:$0]  %s21_s26, 256, %s23_s28, [#allocation3], %s253_s29, %s253_s29, %s254_s30  }
   0x5   :  { %248 = dma.done.wait [#allocation3], 256  }
   0x6   :  { %249 = vsyncadd [#allocation3], 4294967040  ;;  %v46_v0 = vld [vmem:[#allocation2 + $0x8] sm:$0xff]  ;;  %v45_v1 = vld [vmem:[#allocation2] sm:$0xff]  ;;  %vm51_vm0 = vcmask 130048   ;;  %vm91_vm1 = vcmask 261120  }
   0x7   :  { %72 = vmatpush.msra.mxu0 %v46_v0  ;;  %v43_v2 = vld [vmem:[%s355_s0] sm:$0xff]  ;;  %v86_v3 = vld [vmem:[%s358_s3 + $0x18] sm:$0xff]  ;;  %v44_v4 = vld [vmem:[%s355_s0 + $0x8] sm:$0xff]  ;;  %s170_s10 = sshll.u32 %s362_s7, 4  ;;  %s171_s10 = int_to_ptr.hbm [resolvable:$true] %s170_s10 }
   0x8   :  { %110 = vmatpush.msra.mxu1 %v86_v3  ;;  %189 = vmatpush.msra.mxu3 %v86_v3  ;;  %v85_v5 = vld [vmem:[%s358_s3 + $0x10] sm:$0xff]  ;;  %v84_v6 = vld [vmem:[%s358_s3 + $0x8] sm:$0xff]  ;;  %v83_v7 = vld [vmem:[%s358_s3] sm:$0xff] }
   0x9   :  { %73 = vmatpush.msra.mxu0 %v45_v1  ;;  %v126_v8 = vld [vmem:[%s360_s5 + $0x18] sm:$0xff]  ;;  %v197_v9 = vld [vmem:[%s357_s2] ss:$0 sm:$0xff]  ;;  %v125_v16 = vld [vmem:[%s360_s5 + $0x10] sm:$0xff] }
   0xa   :  { %183 = vmatmul.msk.f32.vlgmr.msra.gmra.mxu0 %vm51_vm0, %v43_v2  ;;  %111 = vmatpush.msra.mxu1 %v85_v5  ;;  %v124_v17 = vld [vmem:[%s360_s5 + $0x8] sm:$0xff]  ;;  %v123_v18 = vld [vmem:[%s360_s5] sm:$0xff] }
   0xb   :  { %190 = vmatpush.msra.mxu3 %v85_v5  ;;  %149 = vmatpush.msra.mxu2 %v126_v8  ;;  %v198_v19 = vld [vmem:[%s359_s4] ss:$0 sm:$0xff]  ;;  %s255_s4 = smov [#allocation5]  }
   0xc   :  { %112 = vmatpush.msra.mxu1 %v84_v6  ;;  %v199_v26 = vld [vmem:[%s361_s6] ss:$0 sm:$0xff]  ;;  %s168_s5 = sshll.u32 %s255_s4, 4  ;;  %s169_s5 = int_to_ptr.vmem [resolvable:$true] %s168_s5 }
   0xd   :  { %191 = vmatpush.msra.mxu3 %v84_v6  ;;  %150 = vmatpush.msra.mxu2 %v125_v16 }
   0xe   :  { %113 = vmatpush.msra.mxu1 %v83_v7 }
   0xf   :  { %192 = vmatpush.msra.mxu3 %v83_v7  ;;  %151 = vmatpush.msra.mxu2 %v124_v17 }
  0x11   :  { %152 = vmatpush.msra.mxu2 %v123_v18 }
  0x12   :  { %184 = vmatmul.msk.f32.gmra.mxu0 %vm51_vm0, %v44_v4 }
  0x87   :  { %v75_v10 = vpop.f32.mrf.mxu0 }
  0x88   :  { %v76_v11 = vadd.f32 %v197_v9, %v75_v10 }
  0x8a   :  { %v81_v12 = vmax.f32 %v76_v11, 0.0 }
  0x8c   :  { %185 = vmatmul.msk.f32.vlgmr.msra.gmra.mxu1 %vm91_vm1, %v81_v12 }
  0x8f   :  { %v78_v13 = vpop.f32.mrf.mxu0 }
  0x90   :  { %v79_v14 = vadd.f32 %v197_v9, %v78_v13 }
  0x92   :  { %v82_v15 = vmax.f32 %v79_v14, 0.0 }
  0x94   :  { %186 = vmatmul.msk.f32.vlgmr.msra.gmra.mxu3 %vm91_vm1, %v82_v15 }
 0x109   :  { %v115_v20 = vpop.f32.mrf.mxu1 }
 0x10a   :  { %v116_v21 = vadd.f32 %v198_v19, %v115_v20 }
 0x10c   :  { %v121_v22 = vmax.f32 %v116_v21, 0.0 }
 0x10e   :  { %187 = vmatmul.msk.f32.vlgmr.msra.gmra.mxu2 %vm91_vm1, %v121_v22 }
 0x117   :  { %v118_v23 = vpop.f32.mrf.mxu3 }
 0x118   :  { %v119_v24 = vadd.f32 %v198_v19, %v118_v23 }
 0x11a   :  { %v122_v25 = vmax.f32 %v119_v24, 0.0 }
 0x11c   :  { %188 = vmatmul.msk.f32.gmra.mxu2 %vm91_vm1, %v122_v25 }
 0x191   :  { %v154_v27 = vpop.f32.mrf.mxu2 }
 0x192   :  { %v155_v28 = vadd.f32 %v199_v26, %v154_v27 }
 0x194   :  { %v160_v29 = vmax.f32 %v155_v28, 0.0 }
 0x196   :  { %162 = vst.msk [vmem:[#allocation5] sm:$0xff] %vm51_vm0, %v160_v29 }
 0x19f   :  { %v157_v30 = vpop.f32.mrf.mxu2 }
 0x1a0   :  { %v158_v31 = vadd.f32 %v199_v26, %v157_v30 }
 0x1a2   :  { %v161_v32 = vmax.f32 %v158_v31, 0.0 }
 0x1a4   :  { %163 = vst.msk [vmem:[#allocation5 + $0x8] sm:$0xff] %vm51_vm0, %v161_v32 }
 0x1a5   :  { %176 = dma.vmem_to_hbm [thread:$0]  %s169_s5, 256, %s171_s10, [#allocation4], %s253_s29, %s253_s29, %s254_s30  }
 0x1a6   :  { %250 = dma.done.wait [#allocation4], 256  }
 0x1a7   :  { %251 = vsyncadd [#allocation4], 4294967040 }
 0x1a8   :  { %181 = vsyncpa [#allocation3], 1 }
 0x1a9   :  { %182 = vsyncpa [#allocation4], 1 }

</bundles_post_ra>
